<compile_context>
chip_gen: v6e
topology: v6e:2x2x1
jax: 0.10.0
libtpu: 0.0.40
codegen_flags: <defaults>
</compile_context>

<pallas_src>
import jax
import jax.numpy as jnp
from jax.experimental import pallas as pl
from jax.experimental.pallas import tpu as pltpu

OUTPUT_DIM = 64                       # output_dim default of the module
NUM_ARTISTS = 412                     # synthetic len(unique_artists)
VOCAB = NUM_ARTISTS + 100             # nn.Embedding(len(unique_artists) + 100, output_dim)
BATCH = 8                             # number of tracks in artists_batch
MAX_ARTISTS = 8                       # padded artists-per-track


# ------------------------------ shared helper ---------------------------------
def _build_pool_weights(idx, w, vocab_base, vocab_tile):
    """weights[b, t] = sum_a w[b, a] * (idx[b, a] == vocab_base + t).   VPU-only."""
    bsz, amax = idx.shape
    vocab_ids = vocab_base + jax.lax.broadcasted_iota(jnp.int32, (1, vocab_tile), 1)
    weights = jnp.zeros((bsz, vocab_tile), jnp.float32)
    for a in range(amax):             # small static unroll over padded artist slots
        weights = weights + jnp.where(idx[:, a:a + 1] == vocab_ids, w[:, a:a + 1], 0.0)
    return weights


# --------------------------------- kernels -------------------------------------
def mean_embed_fused_kernel(idx_ref, w_ref, emb_ref, out_ref):
    """Single-step path: entire table resident in one VMEM block (small vocab)."""
    tv, _ = emb_ref.shape
    weights = _build_pool_weights(idx_ref[...], w_ref[...], 0, tv)       # [B, V]
    out_ref[...] = jnp.dot(weights, emb_ref[...],
                           preferred_element_type=jnp.float32)


def mean_embed_stream_kernel(idx_ref, w_ref, emb_ref, out_ref, acc_ref):
    """Large-vocab path: stream table tiles, accumulate in VMEM scratch,
    store the output exactly once at the last vocab step."""
    v = pl.program_id(0)
    tv, _ = emb_ref.shape

    @pl.when(v == 0)
    def _():
        acc_ref[...] = jnp.zeros_like(acc_ref)

    weights = _build_pool_weights(idx_ref[...], w_ref[...], v * tv, tv)  # [B, tv]
    acc_ref[...] += jnp.dot(weights, emb_ref[...],
                            preferred_element_type=jnp.float32)

    @pl.when(v == pl.num_programs(0) - 1)
    def _():
        out_ref[...] = acc_ref[...].astype(out_ref.dtype)


# -------------------------------- wrapper ---------------------------------------
def playlist_artist_encoder_forward(emb_table, artist_idx, artist_mask,
                                     vocab_tile=None):
    """Equivalent of PlaylistAwareArtistEncoder.forward on pre-mapped artist ids.

    artist_idx:  [B, A] int32 padded artist ids (pad slots hold 0)
    artist_mask: [B, A] f32   validity mask (1 = real artist, 0 = pad)
    """
    B, A = artist_idx.shape
    V, D = emb_table.shape

    # Normalization hoisted out of the kernel (runs once per call, not per vocab step).
    w = (artist_mask /
         jnp.maximum(jnp.sum(artist_mask, axis=1, keepdims=True), 1.0)).astype(jnp.float32)
    idx = artist_idx.astype(jnp.int32)

    if vocab_tile is None or vocab_tile >= V:
        # Table fits one VMEM block: single invocation, no grid, no accumulator RMW.
        return pl.pallas_call(
            mean_embed_fused_kernel,
            out_shape=jax.ShapeDtypeStruct((B, D), jnp.float32),
        )(idx, w, emb_table)

    # Streamed-table path for vocabs that do not fit a single VMEM block.
    tv = vocab_tile
    n_steps = pl.cdiv(V, tv)
    v_pad = n_steps * tv
    if v_pad != V:
        # Pad with explicit zeros so the tail tile DMA never reads uninitialized HBM.
        emb_table = jnp.concatenate(
            [emb_table, jnp.zeros((v_pad - V, D), emb_table.dtype)], axis=0)

    return pl.pallas_call(
        mean_embed_stream_kernel,
        out_shape=jax.ShapeDtypeStruct((B, D), jnp.float32),
        grid_spec=pltpu.PrefetchScalarGridSpec(
            num_scalar_prefetch=0,
            grid=(n_steps,),
            in_specs=[
                pl.BlockSpec((B, A), lambda v: (0, 0)),     # artist ids (VMEM-resident)
                pl.BlockSpec((B, A), lambda v: (0, 0)),     # normalized slot weights
                pl.BlockSpec((tv, D), lambda v: (v, 0)),    # streamed embedding tile
            ],
            out_specs=pl.BlockSpec((B, D), lambda v: (0, 0)),  # written once at last step
            scratch_shapes=[pltpu.VMEM((B, D), jnp.float32)],  # f32 accumulator
        ),
        compiler_params=pltpu.CompilerParams(
            # vocab axis is a reduction -> must stay "arbitrary" (no megacore split here)
            dimension_semantics=("arbitrary",)),
    )(idx, w, emb_table)


# ---------------------------------- main -----------------------------------------
if __name__ == "__main__":
    key = jax.random.PRNGKey(0)
    k_emb, k_cent, k_idx = jax.random.split(key, 3)

    # TODO(synk): networkx playlist-graph construction, pagerank/degree-centrality,
    # MD5-keyed pickle caching, artist<->id string dicts and dynamic
    # register_new_artist() are host-side python with no Pallas equivalent; only
    # their numeric effect on the embedding table (centrality-scaled gaussian rows,
    # zero rows for the +100 spare slots) is emulated here.
    std = (2.0 / (NUM_ARTISTS + OUTPUT_DIM)) ** 0.5
    centrality = jax.random.uniform(k_cent, (NUM_ARTISTS, 1), jnp.float32, 0.05, 1.0)
    known_rows = (jax.random.normal(k_emb, (NUM_ARTISTS, OUTPUT_DIM), jnp.float32)
                  * std * centrality)
    emb_table = jnp.concatenate(
        [known_rows, jnp.zeros((VOCAB - NUM_ARTISTS, OUTPUT_DIM), jnp.float32)], axis=0)

    # Pre-mapped artists_batch: each track has a variable number of artist ids,
    # padded to MAX_ARTISTS with mask=0 (pad id 0 is ignored via the mask).
    lengths = jnp.array([3, 1, 5, 2, 8, 4, 1, 6], dtype=jnp.int32)
    positions = jnp.arange(MAX_ARTISTS)[None, :]
    artist_mask = (positions < lengths[:, None]).astype(jnp.float32)          # [B, A]
    artist_idx = jax.random.randint(k_idx, (BATCH, MAX_ARTISTS), 0, NUM_ARTISTS, jnp.int32)
    artist_idx = artist_idx * artist_mask.astype(jnp.int32)

    # Pure-JAX reference: gather + masked mean (== torch.mean over each track).
    ref = (emb_table[artist_idx] * artist_mask[:, :, None]).sum(axis=1)
    ref = ref / jnp.maximum(artist_mask.sum(axis=1, keepdims=True), 1.0)

    # Path 1 (default): single fused step — the 512x64 table fits one VMEM block.
    out = playlist_artist_encoder_forward(emb_table, artist_idx, artist_mask)
    out = jax.block_until_ready(out)
    assert out.shape == (BATCH, OUTPUT_DIM)
    assert bool(jnp.all(jnp.isfinite(out)))
    assert bool(jnp.allclose(out, ref, atol=1e-5, rtol=1e-5))

    # Path 2: streamed-table / scratch-accumulator path, exercised with a forced
    # small tile so the large-vocab codepath is also compiled and verified.
    out2 = playlist_artist_encoder_forward(emb_table, artist_idx, artist_mask,
                                           vocab_tile=128)
    out2 = jax.block_until_ready(out2)
    assert out2.shape == (BATCH, OUTPUT_DIM)
    assert bool(jnp.allclose(out2, ref, atol=1e-5, rtol=1e-5))

    print("KERNEL_OK")
</pallas_src>

<mosaic_0001>
module attributes {stable_mosaic.version = 11 : i64} {
  func.func @mean_embed_fused_kernel(%arg0: memref<8x8xi32, #tpu.memory_space<vmem>>, %arg1: memref<8x8xf32, #tpu.memory_space<vmem>>, %arg2: memref<512x64xf32, #tpu.memory_space<vmem>>, %arg3: memref<8x64xf32, #tpu.memory_space<vmem>>) attributes {dimension_semantics = [], scalar_prefetch = 0 : i64, scratch_operands = 0 : i64, tpu.core_type = #tpu.core_type<tc>} {
    %c0 = arith.constant 0 : index
    %c0_0 = arith.constant 0 : index
    %0 = vector.load %arg0[%c0, %c0_0] : memref<8x8xi32, #tpu.memory_space<vmem>>, vector<8x8xi32>
    %c0_1 = arith.constant 0 : index
    %c0_2 = arith.constant 0 : index
    %1 = vector.load %arg1[%c0_1, %c0_2] : memref<8x8xf32, #tpu.memory_space<vmem>>, vector<8x8xf32>
    %2 = tpu.iota {dimensions = array<i32: 1>} : vector<1x512xi32>
    %c0_i32 = arith.constant 0 : i32
    %3 = vector.broadcast %c0_i32 : i32 to vector<1x512xi32>
    %4 = arith.addi %3, %2 : vector<1x512xi32>
    %cst = arith.constant 0.000000e+00 : f32
    %5 = vector.broadcast %cst : f32 to vector<8x512xf32>
    %6 = vector.extract_strided_slice %0 {offsets = [0, 0], sizes = [8, 1], strides = [1, 1]} : vector<8x8xi32> to vector<8x1xi32>
    %7 = vector.broadcast %6 : vector<8x1xi32> to vector<8x512xi32>
    %8 = vector.broadcast %4 : vector<1x512xi32> to vector<8x512xi32>
    %9 = arith.cmpi eq, %7, %8 : vector<8x512xi32>
    %10 = vector.extract_strided_slice %1 {offsets = [0, 0], sizes = [8, 1], strides = [1, 1]} : vector<8x8xf32> to vector<8x1xf32>
    %cst_3 = arith.constant 0.000000e+00 : f32
    %11 = vector.shape_cast %10 : vector<8x1xf32> to vector<8x1xf32>
    %12 = vector.broadcast %11 : vector<8x1xf32> to vector<8x512xf32>
    %13 = vector.broadcast %cst_3 : f32 to vector<8x512xf32>
    %14 = arith.select %9, %12, %13 : vector<8x512xi1>, vector<8x512xf32>
    %15 = arith.addf %5, %14 : vector<8x512xf32>
    %16 = vector.extract_strided_slice %0 {offsets = [0, 1], sizes = [8, 1], strides = [1, 1]} : vector<8x8xi32> to vector<8x1xi32>
    %17 = vector.broadcast %16 : vector<8x1xi32> to vector<8x512xi32>
    %18 = vector.broadcast %4 : vector<1x512xi32> to vector<8x512xi32>
    %19 = arith.cmpi eq, %17, %18 : vector<8x512xi32>
    %20 = vector.extract_strided_slice %1 {offsets = [0, 1], sizes = [8, 1], strides = [1, 1]} : vector<8x8xf32> to vector<8x1xf32>
    %cst_4 = arith.constant 0.000000e+00 : f32
    %21 = vector.shape_cast %20 : vector<8x1xf32> to vector<8x1xf32>
    %22 = vector.broadcast %21 : vector<8x1xf32> to vector<8x512xf32>
    %23 = vector.broadcast %cst_4 : f32 to vector<8x512xf32>
    %24 = arith.select %19, %22, %23 : vector<8x512xi1>, vector<8x512xf32>
    %25 = arith.addf %15, %24 : vector<8x512xf32>
    %26 = vector.extract_strided_slice %0 {offsets = [0, 2], sizes = [8, 1], strides = [1, 1]} : vector<8x8xi32> to vector<8x1xi32>
    %27 = vector.broadcast %26 : vector<8x1xi32> to vector<8x512xi32>
    %28 = vector.broadcast %4 : vector<1x512xi32> to vector<8x512xi32>
    %29 = arith.cmpi eq, %27, %28 : vector<8x512xi32>
    %30 = vector.extract_strided_slice %1 {offsets = [0, 2], sizes = [8, 1], strides = [1, 1]} : vector<8x8xf32> to vector<8x1xf32>
    %cst_5 = arith.constant 0.000000e+00 : f32
    %31 = vector.shape_cast %30 : vector<8x1xf32> to vector<8x1xf32>
    %32 = vector.broadcast %31 : vector<8x1xf32> to vector<8x512xf32>
    %33 = vector.broadcast %cst_5 : f32 to vector<8x512xf32>
    %34 = arith.select %29, %32, %33 : vector<8x512xi1>, vector<8x512xf32>
    %35 = arith.addf %25, %34 : vector<8x512xf32>
    %36 = vector.extract_strided_slice %0 {offsets = [0, 3], sizes = [8, 1], strides = [1, 1]} : vector<8x8xi32> to vector<8x1xi32>
    %37 = vector.broadcast %36 : vector<8x1xi32> to vector<8x512xi32>
    %38 = vector.broadcast %4 : vector<1x512xi32> to vector<8x512xi32>
    %39 = arith.cmpi eq, %37, %38 : vector<8x512xi32>
    %40 = vector.extract_strided_slice %1 {offsets = [0, 3], sizes = [8, 1], strides = [1, 1]} : vector<8x8xf32> to vector<8x1xf32>
    %cst_6 = arith.constant 0.000000e+00 : f32
    %41 = vector.shape_cast %40 : vector<8x1xf32> to vector<8x1xf32>
    %42 = vector.broadcast %41 : vector<8x1xf32> to vector<8x512xf32>
    %43 = vector.broadcast %cst_6 : f32 to vector<8x512xf32>
    %44 = arith.select %39, %42, %43 : vector<8x512xi1>, vector<8x512xf32>
    %45 = arith.addf %35, %44 : vector<8x512xf32>
    %46 = vector.extract_strided_slice %0 {offsets = [0, 4], sizes = [8, 1], strides = [1, 1]} : vector<8x8xi32> to vector<8x1xi32>
    %47 = vector.broadcast %46 : vector<8x1xi32> to vector<8x512xi32>
    %48 = vector.broadcast %4 : vector<1x512xi32> to vector<8x512xi32>
    %49 = arith.cmpi eq, %47, %48 : vector<8x512xi32>
    %50 = vector.extract_strided_slice %1 {offsets = [0, 4], sizes = [8, 1], strides = [1, 1]} : vector<8x8xf32> to vector<8x1xf32>
    %cst_7 = arith.constant 0.000000e+00 : f32
    %51 = vector.shape_cast %50 : vector<8x1xf32> to vector<8x1xf32>
    %52 = vector.broadcast %51 : vector<8x1xf32> to vector<8x512xf32>
    %53 = vector.broadcast %cst_7 : f32 to vector<8x512xf32>
    %54 = arith.select %49, %52, %53 : vector<8x512xi1>, vector<8x512xf32>
    %55 = arith.addf %45, %54 : vector<8x512xf32>
    %56 = vector.extract_strided_slice %0 {offsets = [0, 5], sizes = [8, 1], strides = [1, 1]} : vector<8x8xi32> to vector<8x1xi32>
    %57 = vector.broadcast %56 : vector<8x1xi32> to vector<8x512xi32>
    %58 = vector.broadcast %4 : vector<1x512xi32> to vector<8x512xi32>
    %59 = arith.cmpi eq, %57, %58 : vector<8x512xi32>
    %60 = vector.extract_strided_slice %1 {offsets = [0, 5], sizes = [8, 1], strides = [1, 1]} : vector<8x8xf32> to vector<8x1xf32>
    %cst_8 = arith.constant 0.000000e+00 : f32
    %61 = vector.shape_cast %60 : vector<8x1xf32> to vector<8x1xf32>
    %62 = vector.broadcast %61 : vector<8x1xf32> to vector<8x512xf32>
    %63 = vector.broadcast %cst_8 : f32 to vector<8x512xf32>
    %64 = arith.select %59, %62, %63 : vector<8x512xi1>, vector<8x512xf32>
    %65 = arith.addf %55, %64 : vector<8x512xf32>
    %66 = vector.extract_strided_slice %0 {offsets = [0, 6], sizes = [8, 1], strides = [1, 1]} : vector<8x8xi32> to vector<8x1xi32>
    %67 = vector.broadcast %66 : vector<8x1xi32> to vector<8x512xi32>
    %68 = vector.broadcast %4 : vector<1x512xi32> to vector<8x512xi32>
    %69 = arith.cmpi eq, %67, %68 : vector<8x512xi32>
    %70 = vector.extract_strided_slice %1 {offsets = [0, 6], sizes = [8, 1], strides = [1, 1]} : vector<8x8xf32> to vector<8x1xf32>
    %cst_9 = arith.constant 0.000000e+00 : f32
    %71 = vector.shape_cast %70 : vector<8x1xf32> to vector<8x1xf32>
    %72 = vector.broadcast %71 : vector<8x1xf32> to vector<8x512xf32>
    %73 = vector.broadcast %cst_9 : f32 to vector<8x512xf32>
    %74 = arith.select %69, %72, %73 : vector<8x512xi1>, vector<8x512xf32>
    %75 = arith.addf %65, %74 : vector<8x512xf32>
    %76 = vector.extract_strided_slice %0 {offsets = [0, 7], sizes = [8, 1], strides = [1, 1]} : vector<8x8xi32> to vector<8x1xi32>
    %77 = vector.broadcast %76 : vector<8x1xi32> to vector<8x512xi32>
    %78 = vector.broadcast %4 : vector<1x512xi32> to vector<8x512xi32>
    %79 = arith.cmpi eq, %77, %78 : vector<8x512xi32>
    %80 = vector.extract_strided_slice %1 {offsets = [0, 7], sizes = [8, 1], strides = [1, 1]} : vector<8x8xf32> to vector<8x1xf32>
    %cst_10 = arith.constant 0.000000e+00 : f32
    %81 = vector.shape_cast %80 : vector<8x1xf32> to vector<8x1xf32>
    %82 = vector.broadcast %81 : vector<8x1xf32> to vector<8x512xf32>
    %83 = vector.broadcast %cst_10 : f32 to vector<8x512xf32>
    %84 = arith.select %79, %82, %83 : vector<8x512xi1>, vector<8x512xf32>
    %85 = arith.addf %75, %84 : vector<8x512xf32>
    %c0_11 = arith.constant 0 : index
    %c0_12 = arith.constant 0 : index
    %86 = vector.load %arg2[%c0_11, %c0_12] : memref<512x64xf32, #tpu.memory_space<vmem>>, vector<512x64xf32>
    %cst_13 = arith.constant dense<0.000000e+00> : vector<8x64xf32>
    %87 = tpu.matmul %85, %86, %cst_13 {dimension_numbers = #tpu.dot_dimension_numbers<[1], [0], [0], [1], [0, 0, 1, 1], [], []>} : vector<8x512xf32>, vector<512x64xf32>, vector<8x64xf32> -> vector<8x64xf32>
    %c0_14 = arith.constant 0 : index
    %c0_15 = arith.constant 0 : index
    %88 = vector.load %arg3[%c0_14, %c0_15] : memref<8x64xf32, #tpu.memory_space<vmem>>, vector<8x64xf32>
    tpu.vector_store %arg3[%c0_14, %c0_15], %87 {strides = array<i32>} : memref<8x64xf32, #tpu.memory_space<vmem>>, vector<8x64xf32>,
    return
  }
}

</mosaic_0001>

<bundles_post_ra>
// kernel: tpu_custom_call.1
= control target key start
LH: loop header
LB: loop body
LE: loop exit
PB: predicated region body
PF: predicated region fallthrough
CT: control target
= control target key end

     0   :  { %v510_v2 = vmov 0   ;;  %s813_s0 = inlined_call_operand.vmem [shape: s32[8,8], index: 0, kind: input, shape index: {}]   ;;  %s814_s1 = inlined_call_operand.vmem [shape: f32[8,8], index: 1, kind: input, shape index: {}]   ;;  %s815_s2 = inlined_call_operand.vmem [shape: f32[512,64], index: 2, kind: input, shape index: {}]   ;;  %s816_s3 = inlined_call_operand.hbm [shape: f32[8,64], index: 3, kind: output, shape index: {}]  }
   0x1   :  { %v542_v0 = vld [vmem:[%s814_s1] sm:$0xff]  ;;  %476 = vset.pattern.permute.xlu1 %v510_v2  ;;  %474 = vset.pattern.permute.xlu0 %v510_v2 }
   0x2   :  { %v547_v1 = vld [vmem:[%s813_s0] sm:$0xff] }
   0x3   :  { %8 = vsyncpa [#allocation3], 0  ;;  %31 = vperm.xlu1 %476, %v542_v0   ;;  %23 = vperm.xlu0 %474, %v547_v1   ;;  %v511_v3 = vmov 1   ;;  %v512_v4 = vmov 2   ;;  %v206_v5 = vld [vmem:[%s815_s2 + $0xf8] sm:$0xff]  ;;  %v205_v9 = vld [vmem:[%s815_s2 + $0xf0] sm:$0xff] }
   0x4   :  { %v238_v6 = vld [vmem:[%s815_s2 + $0x1f8] sm:$0xff]  ;;  %395 = vmatprep.subr.mxu0 %v206_v5  ;;  %v237_v10 = vld [vmem:[%s815_s2 + $0x1f0] sm:$0xff]  ;;  %v513_v13 = vmov 3   ;;  %v514_v14 = vmov 4   ;;  %v204_v15 = vld [vmem:[%s815_s2 + $0xe8] sm:$0xff]  ;;  %v515_v22 = vmov 5  }
   0x5   :  { %430 = vmatprep.subr.mxu1 %v238_v6  ;;  %v190_v7 = vld [vmem:[%s815_s2 + $0x78] sm:$0xff]  ;;  %v189_v11 = vld [vmem:[%s815_s2 + $0x70] sm:$0xff]  ;;  %v236_v16 = vld [vmem:[%s815_s2 + $0x1e8] sm:$0xff]  ;;  %v516_v29 = vmov 7   ;;  %v517_v44 = vmov 6  }
   0x6   :  { %v222_v8 = vld [vmem:[%s815_s2 + $0x178] sm:$0xff]  ;;  %396 = vmatpush3.msra.mxu0 %v190_v7  ;;  %v221_v12 = vld [vmem:[%s815_s2 + $0x170] sm:$0xff]  ;;  %v188_v17 = vld [vmem:[%s815_s2 + $0x68] sm:$0xff] }
   0x7   :  { %477 = vset.pattern.permute.xlu1 %v511_v3  ;;  %475 = vset.pattern.permute.xlu0 %v511_v3  ;;  %v220_v18 = vld [vmem:[%s815_s2 + $0x168] sm:$0xff]  ;;  %v203_v19 = vld [vmem:[%s815_s2 + $0xe0] sm:$0xff]  ;;  %v202_v24 = vld [vmem:[%s815_s2 + $0xd8] sm:$0xff] }
   0x8   :  { %50 = vperm.xlu1 %477, %v542_v0   ;;  %43 = vperm.xlu0 %475, %v547_v1   ;;  %v235_v20 = vld [vmem:[%s815_s2 + $0x1e0] sm:$0xff]  ;;  %v234_v25 = vld [vmem:[%s815_s2 + $0x1d8] sm:$0xff]  ;;  %v201_v28 = vld [vmem:[%s815_s2 + $0xd0] sm:$0xff] }
   0x9   :  { %431 = vmatpush3.msra.mxu1 %v222_v8  ;;  %397 = vmatprep.subr.mxu0 %v205_v9  ;;  %v187_v21 = vld [vmem:[%s815_s2 + $0x60] sm:$0xff]  ;;  %v186_v26 = vld [vmem:[%s815_s2 + $0x58] sm:$0xff]  ;;  %v233_v30 = vld [vmem:[%s815_s2 + $0x1d0] sm:$0xff] }
   0xa   :  { %432 = vmatprep.subr.mxu1 %v237_v10  ;;  %398 = vmatpush3.msra.mxu0 %v189_v11  ;;  %v219_v23 = vld [vmem:[%s815_s2 + $0x160] sm:$0xff]  ;;  %v218_v27 = vld [vmem:[%s815_s2 + $0x158] sm:$0xff]  ;;  %v185_v31 = vld [vmem:[%s815_s2 + $0x50] sm:$0xff] }
   0xb   :  { %433 = vmatpush3.msra.mxu1 %v221_v12  ;;  %399 = vmatprep.subr.mxu0 %v204_v15  ;;  %v217_v32 = vld [vmem:[%s815_s2 + $0x150] sm:$0xff]  ;;  %v200_v33 = vld [vmem:[%s815_s2 + $0xc8] sm:$0xff]  ;;  %v199_v37 = vld [vmem:[%s815_s2 + $0xc0] sm:$0xff]  ;;  %v17_v12 = vlaneseq }
   0xc   :  { %478 = vset.pattern.permute.xlu1 %v512_v4  ;;  %479 = vset.pattern.permute.xlu0 %v512_v4  ;;  %v232_v34 = vld [vmem:[%s815_s2 + $0x1c8] sm:$0xff]  ;;  %v231_v38 = vld [vmem:[%s815_s2 + $0x1c0] sm:$0xff]  ;;  %v198_v41 = vld [vmem:[%s815_s2 + $0xb8] sm:$0xff] }
   0xd   :  { %62 = vperm.xlu1 %478, %v547_v1   ;;  %69 = vperm.xlu0 %479, %v542_v0   ;;  %v184_v35 = vld [vmem:[%s815_s2 + $0x48] sm:$0xff]  ;;  %v183_v39 = vld [vmem:[%s815_s2 + $0x40] sm:$0xff]  ;;  %v230_v42 = vld [vmem:[%s815_s2 + $0x1b8] sm:$0xff]  ;;  %v759_v15 = vand.u32 127, %v17_v12 }
   0xe   :  { %434 = vmatprep.subr.mxu1 %v236_v16  ;;  %400 = vmatpush3.msra.mxu0 %v188_v17  ;;  %v216_v36 = vld [vmem:[%s815_s2 + $0x148] sm:$0xff]  ;;  %v215_v40 = vld [vmem:[%s815_s2 + $0x140] sm:$0xff]  ;;  %v182_v43 = vld [vmem:[%s815_s2 + $0x38] sm:$0xff] }
   0xf   :  { %435 = vmatpush3.msra.mxu1 %v220_v18  ;;  %401 = vmatprep.subr.mxu0 %v203_v19  ;;  %v214_v45 = vld [vmem:[%s815_s2 + $0x138] sm:$0xff]  ;;  %v197_v46 = vld [vmem:[%s815_s2 + $0xb0] sm:$0xff]  ;;  %v196_v50 = vld [vmem:[%s815_s2 + $0xa8] sm:$0xff]  ;;  %v762_v17 = vadd.s32 128, %v759_v15  ;;  %v765_v19 = vadd.s32 256, %v759_v15 }
  0x10   :  { %436 = vmatprep.subr.mxu1 %v235_v20  ;;  %402 = vmatpush3.msra.mxu0 %v187_v21  ;;  %v229_v47 = vld [vmem:[%s815_s2 + $0x1b0] sm:$0xff]  ;;  %v228_v51 = vld [vmem:[%s815_s2 + $0x1a8] sm:$0xff]  ;;  %v195_v54 = vld [vmem:[%s815_s2 + $0xa0] sm:$0xff]  ;;  %v768_v20 = vadd.s32 384, %v759_v15 }
  0x11   :  { %480 = vset.pattern.permute.xlu1 %v513_v13  ;;  %481 = vset.pattern.permute.xlu0 %v514_v14  ;;  %v181_v48 = vld [vmem:[%s815_s2 + $0x30] sm:$0xff]  ;;  %v180_v52 = vld [vmem:[%s815_s2 + $0x28] sm:$0xff]  ;;  %v227_v55 = vld [vmem:[%s815_s2 + $0x1a0] sm:$0xff] }
  0x12   :  { %81 = vperm.xlu1 %480, %v547_v1   ;;  %100 = vperm.xlu0 %481, %v547_v1   ;;  %v213_v49 = vld [vmem:[%s815_s2 + $0x130] sm:$0xff]  ;;  %v212_v53 = vld [vmem:[%s815_s2 + $0x128] sm:$0xff]  ;;  %v179_v56 = vld [vmem:[%s815_s2 + $0x20] sm:$0xff] }
  0x13   :  { %437 = vmatpush3.msra.mxu1 %v219_v23  ;;  %403 = vmatprep.subr.mxu0 %v202_v24  ;;  %v211_v57 = vld [vmem:[%s815_s2 + $0x120] sm:$0xff]  ;;  %v194_v58 = vld [vmem:[%s815_s2 + $0x98] sm:$0xff]  ;;  %v193_v62 = vld [vmem:[%s815_s2 + $0x90] sm:$0xff] }
  0x14   :  { %438 = vmatprep.subr.mxu1 %v234_v25  ;;  %404 = vmatpush3.msra.mxu0 %v186_v26  ;;  %v226_v59 = vld [vmem:[%s815_s2 + $0x198] sm:$0xff]  ;;  %v225_v63 = vld [vmem:[%s815_s2 + $0x190] sm:$0xff]  ;;  %v224_v3 = vld [vmem:[%s815_s2 + $0x188] sm:$0xff] }
  0x15   :  { %439 = vmatpush3.msra.mxu1 %v218_v27  ;;  %405 = vmatprep.subr.mxu0 %v201_v28  ;;  %v178_v60 = vld [vmem:[%s815_s2 + $0x18] sm:$0xff]  ;;  %v209_v2 = vld [vmem:[%s815_s2 + $0x110] sm:$0xff]  ;;  %v176_v4 = vld [vmem:[%s815_s2 + $0x8] sm:$0xff] }
  0x16   :  { %88 = vperm.xlu1 %480, %v542_v0   ;;  %484 = vset.pattern.permute.xlu0 %v515_v22  ;;  %v210_v61 = vld [vmem:[%s815_s2 + $0x118] sm:$0xff]  ;;  %v208_v5 = vld [vmem:[%s815_s2 + $0x108] sm:$0xff]  ;;  %v191_v6 = vld [vmem:[%s815_s2 + $0x80] sm:$0xff] }
  0x17   :  { %126 = vperm.xlu0 %484, %v542_v0   ;;  %440 = vmatprep.subr.mxu1 %v233_v30  ;;  %v223_v7 = vld [vmem:[%s815_s2 + $0x180] sm:$0xff] }
  0x18   :  { %406 = vmatpush3.msra.mxu0 %v185_v31  ;;  %441 = vmatpush3.msra.mxu1 %v217_v32  ;;  %v175_v8 = vld [vmem:[%s815_s2] sm:$0xff] }
  0x19   :  { %407 = vmatprep.subr.mxu0 %v200_v33  ;;  %442 = vmatprep.subr.mxu1 %v232_v34  ;;  %v207_v9 = vld [vmem:[%s815_s2 + $0x100] sm:$0xff] }
  0x1a   :  { %482 = vset.pattern.permute.xlu1 %v514_v14  ;;  %408 = vmatpush3.msra.mxu0 %v184_v35 }
  0x1b   :  { %107 = vperm.xlu1 %482, %v542_v0   ;;  %486 = vset.pattern.permute.xlu0 %v516_v29 }
  0x1c   :  { %157 = vperm.xlu0 %486, %v547_v1   ;;  %443 = vmatpush3.msra.mxu1 %v216_v36 }
  0x1d   :  { %409 = vmatprep.subr.mxu0 %v199_v37  ;;  %444 = vmatprep.subr.mxu1 %v231_v38 }
  0x1e   :  { %410 = vmatpush3.msra.mxu0 %v183_v39  ;;  %445 = vmatpush3.msra.mxu1 %v215_v40 }
  0x1f   :  { %483 = vset.pattern.permute.xlu1 %v515_v22  ;;  %411 = vmatprep.subr.mxu0 %v198_v41 }
  0x20   :  { %119 = vperm.xlu1 %483, %v547_v1   ;;  %446 = vmatprep.subr.mxu1 %v230_v42 }
  0x21   :  { %412 = vmatpush3.msra.mxu0 %v182_v43  ;;  %447 = vmatpush3.msra.mxu1 %v214_v45 }
  0x22   :  { %413 = vmatprep.subr.mxu0 %v197_v46  ;;  %448 = vmatprep.subr.mxu1 %v229_v47 }
  0x23   :  { %414 = vmatpush3.msra.mxu0 %v181_v48  ;;  %449 = vmatpush3.msra.mxu1 %v213_v49 }
  0x24   :  { %485 = vset.pattern.permute.xlu1 %v517_v44  ;;  %415 = vmatprep.subr.mxu0 %v196_v50 }
  0x25   :  { %138 = vperm.xlu1 %485, %v547_v1   ;;  %450 = vmatprep.subr.mxu1 %v228_v51  ;;  %v177_v1 = vld [vmem:[%s815_s2 + $0x10] sm:$0xff] }
  0x26   :  { %416 = vmatpush3.msra.mxu0 %v180_v52  ;;  %451 = vmatpush3.msra.mxu1 %v212_v53 }
  0x27   :  { %417 = vmatprep.subr.mxu0 %v195_v54  ;;  %452 = vmatprep.subr.mxu1 %v227_v55 }
  0x28   :  { %418 = vmatpush3.msra.mxu0 %v179_v56  ;;  %453 = vmatpush3.msra.mxu1 %v211_v57 }
  0x29   :  { %145 = vperm.xlu1 %485, %v542_v0   ;;  %419 = vmatprep.subr.mxu0 %v194_v58 }
  0x2a   :  { %454 = vmatprep.subr.mxu1 %v226_v59  ;;  %420 = vmatpush3.msra.mxu0 %v178_v60 }
  0x2b   :  { %455 = vmatpush3.msra.mxu1 %v210_v61  ;;  %421 = vmatprep.subr.mxu0 %v193_v62 }
  0x2c   :  { %456 = vmatprep.subr.mxu1 %v225_v63  ;;  %422 = vmatpush3.msra.mxu0 %v177_v1 }
  0x2d   :  { %487 = vset.pattern.permute.xlu1 %v516_v29  ;;  %457 = vmatpush3.msra.mxu1 %v209_v2 }
  0x2e   :  { %164 = vperm.xlu1 %487, %v542_v0   ;;  %v192_v0 = vld [vmem:[%s815_s2 + $0x88] sm:$0xff]  ;;  %458 = vmatprep.subr.mxu1 %v224_v3  ;;  %s518_s2 = smov [#allocation2]  }
  0x2f   :  { %423 = vmatprep.subr.mxu0 %v192_v0  ;;  %459 = vmatpush3.msra.mxu1 %v208_v5  ;;  %s387_s26 = sshll.u32 %s518_s2, 4  ;;  %s388_s26 = int_to_ptr.vmem [resolvable:$true] %s387_s26 }
  0x30   :  { %424 = vmatpush3.msra.mxu0 %v176_v4  ;;  %460 = vmatprep.subr.mxu1 %v223_v7  ;;  %s488_s27 = scalar_lea.vmem %s388_s26, 128  ;;  %p493_p1 = scmp.lt.s32.totalorder %s388_s26, %s388_s26 }
  0x31   :  { %425 = vmatprep.subr.mxu0 %v191_v6  ;;  %461 = vmatpush3.msra.mxu1 %v207_v9  ;;  %p489_p0 = scmp.ne.s32.totalorder %s388_s26, %s488_s27  ;;  %p494_p2 = scmp.lt.s32.totalorder %s488_s27, %s488_s27 }
  0x32   :  { %426 = vmatpush3.msra.mxu0 %v175_v8 }
  0x33   :  { %p495_p3 = por %p494_p2, %p493_p1 }
  0x35   :  { %p496_p4 = pnand %p495_p3, %p489_p0 }
  0x7e   :  { %v32_v10 = vpop.permute.xlu1 %31  ;;  %v24_v14 = vpop.permute.xlu0 %23 }
  0x7f   :  { %vm25_vm2 = vcmp.eq.s32.totalorder %v24_v14, %v759_v15  ;;  %vm26_vm3 = vcmp.eq.s32.totalorder %v24_v14, %v762_v17  ;;  %vm27_vm8 = vcmp.eq.s32.totalorder %v24_v14, %v765_v19  ;;  %vm28_vm9 = vcmp.eq.s32.totalorder %v24_v14, %v768_v20 }
  0x80   :  { %v34_v25 = vsel %vm25_vm2, %v32_v10, 0.0  ;;  %v35_v26 = vsel %vm26_vm3, %v32_v10, 0.0  ;;  %v36_v33 = vsel %vm27_vm8, %v32_v10, 0.0  ;;  %v37_v34 = vsel %vm28_vm9, %v32_v10, 0.0 }
  0x83   :  { %v51_v11 = vpop.permute.xlu1 %50  ;;  %v44_v18 = vpop.permute.xlu0 %43 }
  0x84   :  { %vm45_vm0 = vcmp.eq.s32.totalorder %v44_v18, %v759_v15  ;;  %vm46_vm1 = vcmp.eq.s32.totalorder %v44_v18, %v762_v17  ;;  %vm47_vm4 = vcmp.eq.s32.totalorder %v44_v18, %v765_v19  ;;  %vm48_vm5 = vcmp.eq.s32.totalorder %v44_v18, %v768_v20 }
  0x85   :  { %v53_v23 = vsel %vm45_vm0, %v51_v11, 0.0  ;;  %v54_v24 = vsel %vm46_vm1, %v51_v11, 0.0  ;;  %v55_v27 = vsel %vm47_vm4, %v51_v11, 0.0  ;;  %v56_v28 = vsel %vm48_vm5, %v51_v11, 0.0 }
  0x86   :  { %v57_v35 = vadd.f32 %v53_v23, %v34_v25  ;;  %v58_v36 = vadd.f32 %v54_v24, %v35_v26  ;;  %v59_v37 = vadd.f32 %v55_v27, %v36_v33  ;;  %v60_v38 = vadd.f32 %v56_v28, %v37_v34 }
  0x88   :  { %v63_v13 = vpop.permute.xlu1 %62  ;;  %v70_v22 = vpop.permute.xlu0 %69 }
  0x89   :  { %vm64_vm6 = vcmp.eq.s32.totalorder %v63_v13, %v759_v15  ;;  %vm65_vm7 = vcmp.eq.s32.totalorder %v63_v13, %v762_v17  ;;  %vm66_vm10 = vcmp.eq.s32.totalorder %v63_v13, %v765_v19  ;;  %vm67_vm11 = vcmp.eq.s32.totalorder %v63_v13, %v768_v20 }
  0x8a   :  { %v72_v30 = vsel %vm64_vm6, %v70_v22, 0.0  ;;  %v73_v31 = vsel %vm65_vm7, %v70_v22, 0.0  ;;  %v74_v39 = vsel %vm66_vm10, %v70_v22, 0.0  ;;  %v75_v40 = vsel %vm67_vm11, %v70_v22, 0.0 }
  0x8b   :  { %v76_v41 = vadd.f32 %v72_v30, %v57_v35  ;;  %v77_v42 = vadd.f32 %v73_v31, %v58_v36  ;;  %v78_v49 = vadd.f32 %v74_v39, %v59_v37  ;;  %v79_v50 = vadd.f32 %v75_v40, %v60_v38 }
  0x8d   :  { %v82_v16 = vpop.permute.xlu1 %81  ;;  %v101_v32 = vpop.permute.xlu0 %100 }
  0x8e   :  { %vm83_vm12 = vcmp.eq.s32.totalorder %v82_v16, %v759_v15  ;;  %vm84_vm13 = vcmp.eq.s32.totalorder %v82_v16, %v762_v17  ;;  %vm85_vm14 = vcmp.eq.s32.totalorder %v82_v16, %v765_v19  ;;  %vm86_vm15 = vcmp.eq.s32.totalorder %v82_v16, %v768_v20 }
  0x8f   :  { %vm102_vm0 = vcmp.eq.s32.totalorder %v101_v32, %v759_v15  ;;  %vm104_vm1 = vcmp.eq.s32.totalorder %v101_v32, %v765_v19  ;;  %vm103_vm2 = vcmp.eq.s32.totalorder %v101_v32, %v762_v17  ;;  %vm105_vm3 = vcmp.eq.s32.totalorder %v101_v32, %v768_v20 }
  0x91   :  { %v89_v21 = vpop.permute.xlu1 %88 }
  0x92   :  { %v127_v44 = vpop.permute.xlu0 %126  ;;  %v91_v45 = vsel %vm83_vm12, %v89_v21, 0.0  ;;  %v92_v46 = vsel %vm84_vm13, %v89_v21, 0.0  ;;  %v93_v47 = vsel %vm85_vm14, %v89_v21, 0.0  ;;  %v94_v48 = vsel %vm86_vm15, %v89_v21, 0.0 }
  0x93   :  { %v95_v51 = vadd.f32 %v91_v45, %v76_v41  ;;  %v96_v52 = vadd.f32 %v92_v46, %v77_v42  ;;  %v97_v56 = vadd.f32 %v93_v47, %v78_v49  ;;  %v98_v57 = vadd.f32 %v94_v48, %v79_v50 }
  0x96   :  { %v108_v29 = vpop.permute.xlu1 %107 }
  0x97   :  { %v110_v53 = vsel %vm102_vm0, %v108_v29, 0.0  ;;  %v112_v54 = vsel %vm104_vm1, %v108_v29, 0.0  ;;  %v158_v55 = vpop.permute.xlu0 %157  ;;  %v111_v58 = vsel %vm103_vm2, %v108_v29, 0.0  ;;  %v113_v59 = vsel %vm105_vm3, %v108_v29, 0.0 }
  0x98   :  { %v114_v61 = vadd.f32 %v110_v53, %v95_v51  ;;  %v116_v62 = vadd.f32 %v112_v54, %v97_v56  ;;  %vm159_vm8 = vcmp.eq.s32.totalorder %v158_v55, %v759_v15  ;;  %vm161_vm9 = vcmp.eq.s32.totalorder %v158_v55, %v765_v19 }
  0x99   :  { %v115_v63 = vadd.f32 %v111_v58, %v96_v52  ;;  %vm160_vm10 = vcmp.eq.s32.totalorder %v158_v55, %v762_v17  ;;  %v117_v1 = vadd.f32 %v113_v59, %v98_v57  ;;  %vm162_vm11 = vcmp.eq.s32.totalorder %v158_v55, %v768_v20 }
  0x9a   :  { %vm379_vm0 = vcmask 523264  }
  0x9b   :  { %v120_v43 = vpop.permute.xlu1 %119 }
  0x9c   :  { %vm121_vm4 = vcmp.eq.s32.totalorder %v120_v43, %v759_v15  ;;  %vm122_vm5 = vcmp.eq.s32.totalorder %v120_v43, %v762_v17  ;;  %vm123_vm6 = vcmp.eq.s32.totalorder %v120_v43, %v765_v19  ;;  %vm124_vm7 = vcmp.eq.s32.totalorder %v120_v43, %v768_v20 }
  0x9d   :  { %v129_v2 = vsel %vm121_vm4, %v127_v44, 0.0  ;;  %v131_v0 = vsel %vm123_vm6, %v127_v44, 0.0  ;;  %v130_v4 = vsel %vm122_vm5, %v127_v44, 0.0  ;;  %v132_v5 = vsel %vm124_vm7, %v127_v44, 0.0 }
  0x9e   :  { %v133_v10 = vadd.f32 %v129_v2, %v114_v61  ;;  %v135_v11 = vadd.f32 %v131_v0, %v116_v62  ;;  %v134_v12 = vadd.f32 %v130_v4, %v115_v63  ;;  %v136_v13 = vadd.f32 %v132_v5, %v117_v1 }
  0xa0   :  { %v139_v60 = vpop.permute.xlu1 %138 }
  0xa1   :  { %vm140_vm12 = vcmp.eq.s32.totalorder %v139_v60, %v759_v15  ;;  %vm142_vm13 = vcmp.eq.s32.totalorder %v139_v60, %v765_v19  ;;  %vm141_vm14 = vcmp.eq.s32.totalorder %v139_v60, %v762_v17  ;;  %vm143_vm15 = vcmp.eq.s32.totalorder %v139_v60, %v768_v20 }
  0xa4   :  { %v146_v3 = vpop.permute.xlu1 %145 }
  0xa5   :  { %v148_v6 = vsel %vm140_vm12, %v146_v3, 0.0  ;;  %v150_v7 = vsel %vm142_vm13, %v146_v3, 0.0  ;;  %v149_v8 = vsel %vm141_vm14, %v146_v3, 0.0  ;;  %v151_v9 = vsel %vm143_vm15, %v146_v3, 0.0 }
  0xa6   :  { %v153_v16 = vadd.f32 %v149_v8, %v134_v12  ;;  %v155_v18 = vadd.f32 %v151_v9, %v136_v13  ;;  %v152_v21 = vadd.f32 %v148_v6, %v133_v10  ;;  %v154_v22 = vadd.f32 %v150_v7, %v135_v11 }
  0xa9   :  { %v165_v14 = vpop.permute.xlu1 %164 }
  0xaa   :  { %v167_v23 = vsel %vm159_vm8, %v165_v14, 0.0  ;;  %v169_v24 = vsel %vm161_vm9, %v165_v14, 0.0  ;;  %v168_v25 = vsel %vm160_vm10, %v165_v14, 0.0  ;;  %v170_v26 = vsel %vm162_vm11, %v165_v14, 0.0 }
  0xab   :  { %v172_v27 = vadd.f32 %v168_v25, %v153_v16  ;;  %v174_v28 = vadd.f32 %v170_v26, %v155_v18  ;;  %v171_v29 = vadd.f32 %v167_v23, %v152_v21  ;;  %v173_v30 = vadd.f32 %v169_v24, %v154_v22 }
  0xad   :  { %303 = vmatprep.mubr.f32.mxu0 %v172_v27  ;;  %373 = vmatprep.mubr.f32.mxu1 %v174_v28 }
  0xae   :  { %304 = vmatmul.mubr.f32.vlgmr.msra.gmra.mxu0 %v171_v29  ;;  %374 = vmatmul.mubr.f32.vlgmr.msra.gmra.mxu1 %v173_v30 }
 0x16e   :  { %v427_v31 = vpop.f32.mrf.mxu0  ;;  %v462_v15 = vpop.f32.mrf.mxu1 }
 0x170   :  { %v428_v32 = vpop.f32.mrf.mxu0  ;;  %v463_v33 = vpop.f32.mrf.mxu1 }
 0x171   :  { %v429_v19 = vadd.f32 %v428_v32, %v427_v31  ;;  %v464_v17 = vadd.f32 %v463_v33, %v462_v15 }
 0x173   :  { %v376_v34 = vadd.f32 %v464_v17, %v429_v19 }
 0x175   :  { %380 = vst.msk [vmem:[#allocation2] sm:$0xff] %vm379_vm0, %v376_v34 }
 0x176   :  { %499 = shalt.err (!%p496_p4)
}
 0x177   :  { %390 = dma.vmem_to_hbm [thread:$0]  %s388_s26, 128, %s816_s3, [#allocation3]  }
 0x178   :  { %508 = dma.done.wait [#allocation3], 128  }
 0x179   :  { %509 = vsyncadd [#allocation3], 4294967168 }
 0x17a   :  { %394 = vsyncpa [#allocation3], 1 }

</bundles_post_ra>
